<compile_context>
chip_gen: v7x
topology: tpu7x:2x2x1
jax: 0.10.0
libtpu: 0.0.40
codegen_flags: <defaults>
</compile_context>

<pallas_src>
import jax
import jax.numpy as jnp
from jax.experimental import pallas as pl
from jax.experimental.pallas import tpu as pltpu

IN_FEATURES = 28 * 28   # 784
IN_PAD = 896            # 7 * 128  (K padded for clean MXU passes)
HIDDEN = 256
OUT_FEATURES = 10
OUT_PAD = 128           # lane-dense output / full MXU N width
NEG_BIG = -1.0e30       # finite "-inf": folded into padded bias cols, exp -> 0


def _round_up(x, m):
    return ((x + m - 1) // m) * m


def _mlp_softmax_kernel(x_ref, w1_ref, b1_ref, w2_ref, b2_ref, o_ref):
    # x_ref:  (TB, 896)  bf16      w1_ref: (896, 256) bf16   b1_ref: (1, 256) f32
    # w2_ref: (256, 128) bf16      b2_ref: (1, 128)  f32     o_ref:  (TB, 128) f32
    x = x_ref[...]

    # Linear(784 -> 256) + ReLU  (bf16 MXU matmul, f32 accumulation)
    h = jnp.dot(x, w1_ref[...], preferred_element_type=jnp.float32) + b1_ref[...]
    h = jnp.maximum(h, 0.0).astype(w2_ref.dtype)

    # Linear(256 -> 10), computed at padded width 128. Padded weight columns
    # are zero and padded bias columns are -1e30, so padded logits are ~-1e30
    # and contribute exactly 0 to the softmax (exp underflows to 0).
    logits = (jnp.dot(h, w2_ref[...], preferred_element_type=jnp.float32)
              + b2_ref[...])

    # Numerically stable softmax over dim=1 (matches torch.nn.Softmax(dim=1)).
    m = jnp.max(logits, axis=-1, keepdims=True)
    e = jnp.exp(logits - m)
    denom = jnp.sum(e, axis=-1, keepdims=True)
    # Exact f32 reciprocal (NOT approx) so probabilities sum to 1 precisely.
    o_ref[...] = (e * (1.0 / denom)).astype(o_ref.dtype)


def feed_forward_net(x_nchw, w1, b1, w2, b2, *, tb=256):
    """x_nchw: (B, 1, 28, 28) float32 -> (B, 10) softmax probabilities."""
    B = x_nchw.shape[0]
    # nn.Flatten(): flatten all dims after batch (glue, stays in plain JAX).
    x_flat = x_nchw.reshape(B, -1).astype(jnp.float32)
    assert x_flat.shape[1] == IN_FEATURES

    # Batch tile: multiple of 8, capped at `tb`; pad batch to a whole number of tiles.
    tb_eff = min(tb, _round_up(max(B, 1), 8))
    b_pad = _round_up(B, tb_eff)
    grid = (b_pad // tb_eff,)

    # Pad + cast once in the wrapper (cheap glue). Zero padding does not change
    # the math: extra K columns multiply zero weights, extra output columns get
    # a -1e30 bias (zero softmax weight), extra batch rows are sliced off below.
    x_p = jnp.zeros((b_pad, IN_PAD), jnp.bfloat16)
    x_p = x_p.at[:B, :IN_FEATURES].set(x_flat.astype(jnp.bfloat16))

    w1_p = jnp.zeros((IN_PAD, HIDDEN), jnp.bfloat16)
    w1_p = w1_p.at[:IN_FEATURES, :].set(w1.astype(jnp.bfloat16))
    b1_2d = b1.reshape(1, HIDDEN).astype(jnp.float32)

    w2_p = jnp.zeros((HIDDEN, OUT_PAD), jnp.bfloat16)
    w2_p = w2_p.at[:, :OUT_FEATURES].set(w2.astype(jnp.bfloat16))
    b2_p = jnp.full((1, OUT_PAD), NEG_BIG, jnp.float32)
    b2_p = b2_p.at[0, :OUT_FEATURES].set(b2.astype(jnp.float32))

    # Advisory cost hint for XLA's scheduler.
    flops = 2 * b_pad * (IN_PAD * HIDDEN + HIDDEN * OUT_PAD)
    bytes_accessed = (x_p.size * 2 + w1_p.size * 2 + w2_p.size * 2
                      + b1_2d.size * 4 + b2_p.size * 4 + b_pad * OUT_PAD * 4)

    out = pl.pallas_call(
        _mlp_softmax_kernel,
        out_shape=jax.ShapeDtypeStruct((b_pad, OUT_PAD), jnp.float32),
        grid=grid,
        in_specs=[
            # Batch-tiled activation: pipelined / double-buffered across the grid.
            pl.BlockSpec((tb_eff, IN_PAD), lambda i: (i, 0)),
            # Weights & biases: constant index_map -> resident in VMEM across steps.
            pl.BlockSpec((IN_PAD, HIDDEN), lambda i: (0, 0)),
            pl.BlockSpec((1, HIDDEN), lambda i: (0, 0)),
            pl.BlockSpec((HIDDEN, OUT_PAD), lambda i: (0, 0)),
            pl.BlockSpec((1, OUT_PAD), lambda i: (0, 0)),
        ],
        out_specs=pl.BlockSpec((tb_eff, OUT_PAD), lambda i: (i, 0)),
        compiler_params=pltpu.CompilerParams(
            dimension_semantics=("parallel",),
        ),
        cost_estimate=pl.CostEstimate(
            flops=flops,
            transcendentals=b_pad * OUT_PAD,
            bytes_accessed=bytes_accessed,
        ),
    )(x_p, w1_p, b1_2d, w2_p, b2_p)

    # Strip batch padding and the 118 padded output columns.
    return out[:B, :OUT_FEATURES]


def init_params(key):
    """Deterministic parameter init (shapes match nn.Linear(784,256), nn.Linear(256,10))."""
    k1, k2, k3, k4 = jax.random.split(key, 4)
    # Stored as (in, out): equivalent to torch weight (out, in) transposed.
    bound1 = 1.0 / jnp.sqrt(IN_FEATURES)
    w1 = jax.random.uniform(k1, (IN_FEATURES, HIDDEN), jnp.float32, -bound1, bound1)
    b1 = jax.random.uniform(k2, (HIDDEN,), jnp.float32, -bound1, bound1)
    bound2 = 1.0 / jnp.sqrt(HIDDEN)
    w2 = jax.random.uniform(k3, (HIDDEN, OUT_FEATURES), jnp.float32, -bound2, bound2)
    b2 = jax.random.uniform(k4, (OUT_FEATURES,), jnp.float32, -bound2, bound2)
    return w1, b1, w2, b2


if __name__ == "__main__":
    key = jax.random.PRNGKey(0)
    k_x, k_p = jax.random.split(key)

    # Small batch, MNIST-like NCHW input: (B=2, C=1, H=28, W=28)
    x = jax.random.normal(k_x, (2, 1, 28, 28), dtype=jnp.float32)
    w1, b1, w2, b2 = init_params(k_p)

    probs = feed_forward_net(x, w1, b1, w2, b2)
    probs = jax.block_until_ready(probs)

    # Pure-JAX f32 reference (kernel uses bf16 matmul inputs, so allow a
    # modest elementwise tolerance; row sums are exact since the softmax
    # normalization uses an exact f32 reciprocal).
    x_flat = x.reshape(x.shape[0], -1)
    h_ref = jnp.maximum(x_flat @ w1 + b1, 0.0)
    logits_ref = h_ref @ w2 + b2
    probs_ref = jax.nn.softmax(logits_ref, axis=1)

    assert probs.shape == (2, OUT_FEATURES)
    assert bool(jnp.all(jnp.isfinite(probs)))
    assert jnp.allclose(jnp.sum(probs, axis=1), 1.0, atol=1e-3)
    assert jnp.allclose(probs, probs_ref, atol=2e-2, rtol=2e-2)

    print("KERNEL_OK")
</pallas_src>

<mosaic_0001>
module attributes {stable_mosaic.version = 11 : i64} {
  func.func @_mlp_softmax_kernel(%arg0: i32, %arg1: memref<8x896xbf16, #tpu.memory_space<vmem>>, %arg2: memref<896x256xbf16, #tpu.memory_space<vmem>>, %arg3: memref<1x256xf32, #tpu.memory_space<vmem>>, %arg4: memref<256x128xbf16, #tpu.memory_space<vmem>>, %arg5: memref<1x128xf32, #tpu.memory_space<vmem>>, %arg6: memref<8x128xf32, #tpu.memory_space<vmem>>) attributes {dimension_semantics = [#tpu.dimension_semantics<parallel>], iteration_bounds = array<i64: 1>, scalar_prefetch = 0 : i64, scratch_operands = 0 : i64, tpu.core_type = #tpu.core_type<tc>, window_params = [{transform_indices = @transform_0, window_bounds = array<i64: 8, 896>}, {pipeline_mode = #tpu.pipeline_mode<synchronous>, transform_indices = @transform_1, window_bounds = array<i64: 896, 256>}, {pipeline_mode = #tpu.pipeline_mode<synchronous>, transform_indices = @transform_2, window_bounds = array<i64: 1, 256>}, {pipeline_mode = #tpu.pipeline_mode<synchronous>, transform_indices = @transform_3, window_bounds = array<i64: 256, 128>}, {pipeline_mode = #tpu.pipeline_mode<synchronous>, transform_indices = @transform_4, window_bounds = array<i64: 1, 128>}, {transform_indices = @transform_5, window_bounds = array<i64: 8, 128>}]} {
    %c0 = arith.constant 0 : index
    %c0_0 = arith.constant 0 : index
    %0 = vector.load %arg1[%c0, %c0_0] : memref<8x896xbf16, #tpu.memory_space<vmem>>, vector<8x896xbf16>
    %c0_1 = arith.constant 0 : index
    %c0_2 = arith.constant 0 : index
    %1 = vector.load %arg2[%c0_1, %c0_2] : memref<896x256xbf16, #tpu.memory_space<vmem>>, vector<896x256xbf16>
    %cst = arith.constant dense<0.000000e+00> : vector<8x256xf32>
    %2 = tpu.matmul %0, %1, %cst {dimension_numbers = #tpu.dot_dimension_numbers<[1], [0], [0], [1], [0, 0, 1, 1], [], []>} : vector<8x896xbf16>, vector<896x256xbf16>, vector<8x256xf32> -> vector<8x256xf32>
    %c0_3 = arith.constant 0 : index
    %c0_4 = arith.constant 0 : index
    %3 = vector.load %arg3[%c0_3, %c0_4] : memref<1x256xf32, #tpu.memory_space<vmem>>, vector<1x256xf32>
    %4 = vector.broadcast %3 : vector<1x256xf32> to vector<8x256xf32>
    %5 = arith.addf %2, %4 : vector<8x256xf32>
    %cst_5 = arith.constant 0.000000e+00 : f32
    %6 = vector.broadcast %cst_5 : f32 to vector<8x256xf32>
    %7 = arith.maximumf %5, %6 : vector<8x256xf32>
    %8 = arith.truncf %7 : vector<8x256xf32> to vector<8x256xbf16>
    %c0_6 = arith.constant 0 : index
    %c0_7 = arith.constant 0 : index
    %9 = vector.load %arg4[%c0_6, %c0_7] : memref<256x128xbf16, #tpu.memory_space<vmem>>, vector<256x128xbf16>
    %cst_8 = arith.constant dense<0.000000e+00> : vector<8x128xf32>
    %10 = tpu.matmul %8, %9, %cst_8 {dimension_numbers = #tpu.dot_dimension_numbers<[1], [0], [0], [1], [0, 0, 1, 1], [], []>} : vector<8x256xbf16>, vector<256x128xbf16>, vector<8x128xf32> -> vector<8x128xf32>
    %c0_9 = arith.constant 0 : index
    %c0_10 = arith.constant 0 : index
    %11 = vector.load %arg5[%c0_9, %c0_10] : memref<1x128xf32, #tpu.memory_space<vmem>>, vector<1x128xf32>
    %12 = vector.broadcast %11 : vector<1x128xf32> to vector<8x128xf32>
    %13 = arith.addf %10, %12 : vector<8x128xf32>
    %cst_11 = arith.constant dense<0xFF800000> : vector<8xf32>
    %14 = vector.multi_reduction <maximumf>, %13, %cst_11 [1] : vector<8x128xf32> to vector<8xf32>
    %15 = vector.shape_cast %14 : vector<8xf32> to vector<8x1xf32>
    %16 = vector.broadcast %15 : vector<8x1xf32> to vector<8x128xf32>
    %17 = arith.subf %13, %16 : vector<8x128xf32>
    %18 = math.exp %17 : vector<8x128xf32>
    %cst_12 = arith.constant dense<0.000000e+00> : vector<8xf32>
    %19 = vector.multi_reduction <add>, %18, %cst_12 [1] : vector<8x128xf32> to vector<8xf32>
    %20 = vector.shape_cast %19 : vector<8xf32> to vector<8x1xf32>
    %cst_13 = arith.constant 1.000000e+00 : f32
    %21 = vector.broadcast %cst_13 : f32 to vector<8x1xf32>
    %22 = arith.divf %21, %20 : vector<8x1xf32>
    %23 = vector.broadcast %22 : vector<8x1xf32> to vector<8x128xf32>
    %24 = arith.mulf %18, %23 : vector<8x128xf32>
    %c0_14 = arith.constant 0 : index
    %c0_15 = arith.constant 0 : index
    %25 = vector.load %arg6[%c0_14, %c0_15] : memref<8x128xf32, #tpu.memory_space<vmem>>, vector<8x128xf32>
    tpu.vector_store %arg6[%c0_14, %c0_15], %24 {strides = array<i32>} : memref<8x128xf32, #tpu.memory_space<vmem>>, vector<8x128xf32>,
    return
  }
  func.func @transform_0(%arg0: i32) -> (i32, i32) {
    %c0_i32 = arith.constant 0 : i32
    %c0_i32_0 = arith.constant 0 : i32
    return %arg0, %c0_i32 : i32, i32
  }
  func.func @transform_1(%arg0: i32) -> (i32, i32) {
    %c0_i32 = arith.constant 0 : i32
    %c0_i32_0 = arith.constant 0 : i32
    %c0_i32_1 = arith.constant 0 : i32
    return %c0_i32, %c0_i32_0 : i32, i32
  }
  func.func @transform_2(%arg0: i32) -> (i32, i32) {
    %c0_i32 = arith.constant 0 : i32
    %c0_i32_0 = arith.constant 0 : i32
    %c0_i32_1 = arith.constant 0 : i32
    return %c0_i32, %c0_i32_0 : i32, i32
  }
  func.func @transform_3(%arg0: i32) -> (i32, i32) {
    %c0_i32 = arith.constant 0 : i32
    %c0_i32_0 = arith.constant 0 : i32
    %c0_i32_1 = arith.constant 0 : i32
    return %c0_i32, %c0_i32_0 : i32, i32
  }
  func.func @transform_4(%arg0: i32) -> (i32, i32) {
    %c0_i32 = arith.constant 0 : i32
    %c0_i32_0 = arith.constant 0 : i32
    %c0_i32_1 = arith.constant 0 : i32
    return %c0_i32, %c0_i32_0 : i32, i32
  }
  func.func @transform_5(%arg0: i32) -> (i32, i32) {
    %c0_i32 = arith.constant 0 : i32
    %c0_i32_0 = arith.constant 0 : i32
    return %arg0, %c0_i32 : i32, i32
  }
}

</mosaic_0001>

<bundles_post_ra>
// kernel: tpu_custom_call.1
= control target key start
LH: loop header
LB: loop body
LE: loop exit
PB: predicated region body
PF: predicated region fallthrough
CT: control target
= control target key end

     0   :  { %10 = vsyncpa [#allocation3], 0  ;;  %s1715_s0 = inlined_call_operand.hbm [shape: bf16[8,896], index: 0, kind: input, shape index: {}]   ;;  %s1716_s1 = inlined_call_operand.hbm [shape: bf16[896,256], index: 1, kind: input, shape index: {}]   ;;  %s1717_s2 = inlined_call_operand.vmem [shape: f32[1,256], index: 2, kind: input, shape index: {}]   ;;  %s1718_s3 = inlined_call_operand.hbm [shape: bf16[256,128], index: 3, kind: input, shape index: {}]   ;;  %s1719_s4 = inlined_call_operand.vmem [shape: f32[1,128], index: 4, kind: input, shape index: {}]   ;;  %s1720_s5 = inlined_call_operand.hbm [shape: f32[8,128], index: 5, kind: output, shape index: {}]  }
   0x1   :  { %11 = vsyncpa [#allocation6], 0 }
   0x2   :  { %12 = vsyncpa [#allocation4], 0  ;;  %s1610_s18 = smov [#allocation5]   ;;  %s1516_s22 = scalar_lea.hbm %s1716_s1, 14336 }
   0x3   :  { %s28_s19 = sshll.u32 %s1610_s18, 4  ;;  %p1517_p0 = scmp.ne.s32.totalorder %s1716_s1, %s1516_s22  ;;  %s29_s19 = int_to_ptr.vmem [resolvable:$true] %s28_s19 }
   0x4   :  { %p1520_p1 = scmp.lt.u32.totalorder %s1516_s22, %s1716_s1 }
   0x6   :  { %p1522_p2 = pnand %p1520_p1, %p1517_p0 }
   0x8   :  { %1525 = shalt.err (!%p1522_p2)
}
   0x9   :  { %s1526_s27 = scalar_lea.vmem %s29_s19, 14336  ;;  %p1531_p4 = scmp.lt.s32.totalorder %s29_s19, %s29_s19 }
   0xa   :  { %p1527_p3 = scmp.ne.s32.totalorder %s29_s19, %s1526_s27  ;;  %p1532_p5 = scmp.lt.s32.totalorder %s1526_s27, %s1526_s27 }
   0xc   :  { %p1533_p6 = por %p1532_p5, %p1531_p4 }
   0xe   :  { %p1534_p7 = pnand %p1533_p6, %p1527_p3 }
  0x10   :  { %1537 = shalt.err (!%p1534_p7)
}
  0x11   :  { %s1611_s28 = smov 128   ;;  %s1612_s29 = smov 8  }
  0x12   :  { %34 = dma.hbm_to_vmem [thread:$0]  %s1716_s1, 14336, %s29_s19, [#allocation6], %s1611_s28, %s1611_s28, %s1612_s29  }
  0x13   :  { %s1613_s7 = smov [#allocation2]   ;;  %s1614_s9 = smov [#allocation7]  }
  0x14   :  { %s19_s8 = sshll.u32 %s1613_s7, 4  ;;  %s42_s10 = sshll.u32 %s1614_s9, 4  ;;  %s20_s8 = int_to_ptr.vmem [resolvable:$true] %s19_s8  ;;  %s43_s10 = int_to_ptr.vmem [resolvable:$true] %s42_s10 }
  0x15   :  { %s1538_s13 = scalar_lea.hbm %s1715_s0, 448 }
  0x16   :  { %p1539_p8 = scmp.ne.s32.totalorder %s1715_s0, %s1538_s13  ;;  %p1542_p9 = scmp.lt.u32.totalorder %s1538_s13, %s1715_s0 }
  0x18   :  { %p1544_p10 = pnand %p1542_p9, %p1539_p8 }
  0x1a   :  { %1547 = shalt.err (!%p1544_p10)
}
  0x1b   :  { %s1548_s1 = scalar_lea.vmem %s20_s8, 448  ;;  %p1553_p12 = scmp.lt.s32.totalorder %s20_s8, %s20_s8 }
  0x1c   :  { %p1549_p11 = scmp.ne.s32.totalorder %s20_s8, %s1548_s1  ;;  %p1554_p13 = scmp.lt.s32.totalorder %s1548_s1, %s1548_s1 }
  0x1e   :  { %p1555_p0 = por %p1554_p13, %p1553_p12 }
  0x20   :  { %p1556_p1 = pnand %p1555_p0, %p1549_p11 }
  0x22   :  { %1559 = shalt.err (!%p1556_p1)
}
  0x23   :  { %22 = dma.hbm_to_vmem [thread:$0]  %s1715_s0, 448, %s20_s8, [#allocation3]  }
  0x24   :  { %s1560_s22 = scalar_lea.hbm %s1718_s3, 2048 }
  0x25   :  { %p1561_p2 = scmp.ne.s32.totalorder %s1718_s3, %s1560_s22  ;;  %p1564_p3 = scmp.lt.u32.totalorder %s1560_s22, %s1718_s3 }
  0x27   :  { %p1566_p4 = pnand %p1564_p3, %p1561_p2 }
  0x29   :  { %1569 = shalt.err (!%p1566_p4)
}
  0x2a   :  { %s1570_s27 = scalar_lea.vmem %s43_s10, 2048  ;;  %p1575_p6 = scmp.lt.s32.totalorder %s43_s10, %s43_s10 }
  0x2b   :  { %p1571_p5 = scmp.ne.s32.totalorder %s43_s10, %s1570_s27  ;;  %p1576_p7 = scmp.lt.s32.totalorder %s1570_s27, %s1570_s27 }
  0x2d   :  { %p1577_p8 = por %p1576_p7, %p1575_p6 }
  0x2f   :  { %p1578_p9 = pnand %p1577_p8, %p1571_p5 }
  0x31   :  { %1581 = shalt.err (!%p1578_p9)
}
  0x32   :  { %s1615_s0 = smov 64   ;;  %s1616_s28 = smov 4  }
  0x33   :  { %48 = dma.hbm_to_vmem [thread:$0]  %s1718_s3, 2048, %s43_s10, [#allocation6], %s1615_s0, %s1615_s0, %s1616_s28  }
  0x34   :  { %1604 = dma.done.wait [#allocation3], 448  }
  0x35   :  { %1605 = vsyncadd [#allocation3], 4294966848 }
  0x36   :  { %1606 = dma.done.wait [#allocation6], 16384  }
  0x37   :  { %1607 = vsyncadd [#allocation6], 4294950912  ;;  %v1321_v0 = vld [vmem:[#allocation5 + $0x104] ss:$8 sps:$4 sm:$0xff]   ;;  %v1323_v1 = vld [vmem:[#allocation5 + $0x100] ss:$8 sps:$4 sm:$0xff]  }
  0x38   :  { %815 = vmatprep.subr.bf16.mxu0 %v1321_v0  ;;  %v1324_v2 = vld [vmem:[#allocation5 + $0x114] ss:$8 sps:$4 sm:$0xff]   ;;  %v1326_v3 = vld [vmem:[#allocation5 + $0x110] ss:$8 sps:$4 sm:$0xff]   ;;  %v1327_v4 = vld [vmem:[#allocation5 + $0x124] ss:$8 sps:$4 sm:$0xff]  }
  0x39   :  { %816 = vmatpush1.bf16.msra.mxu0 %v1323_v1  ;;  %v1329_v5 = vld [vmem:[#allocation5 + $0x120] ss:$8 sps:$4 sm:$0xff]   ;;  %v1330_v6 = vld [vmem:[#allocation5 + $0x134] ss:$8 sps:$4 sm:$0xff]   ;;  %v1332_v7 = vld [vmem:[#allocation5 + $0x130] ss:$8 sps:$4 sm:$0xff]  }
  0x3a   :  { %817 = vmatprep.subr.bf16.mxu0 %v1324_v2  ;;  %v1345_v8 = vld [vmem:[#allocation5 + $0x4] ss:$8 sps:$4 sm:$0xff]   ;;  %v1347_v9 = vld [vmem:[#allocation5] ss:$8 sps:$4 sm:$0xff]   ;;  %v1351_v11 = vld [vmem:[#allocation5 + $0x14] ss:$8 sps:$4 sm:$0xff]  }
  0x3b   :  { %v1333_v10 = vld [vmem:[#allocation5 + $0x144] ss:$8 sps:$4 sm:$0xff]   ;;  %774 = vmatprep.subr.bf16.mxu1 %v1345_v8  ;;  %v1353_v12 = vld [vmem:[#allocation5 + $0x10] ss:$8 sps:$4 sm:$0xff]   ;;  %v1335_v13 = vld [vmem:[#allocation5 + $0x140] ss:$8 sps:$4 sm:$0xff]  }
  0x3c   :  { %775 = vmatpush1.bf16.msra.mxu1 %v1347_v9  ;;  %v1336_v14 = vld [vmem:[#allocation5 + $0x154] ss:$8 sps:$4 sm:$0xff]   ;;  %v1357_v15 = vld [vmem:[#allocation5 + $0x24] ss:$8 sps:$4 sm:$0xff]   ;;  %v1359_v16 = vld [vmem:[#allocation5 + $0x20] ss:$8 sps:$4 sm:$0xff]  }
  0x3d   :  { %818 = vmatpush1.bf16.msra.mxu0 %v1326_v3  ;;  %776 = vmatprep.subr.bf16.mxu1 %v1351_v11  ;;  %v1338_v17 = vld [vmem:[#allocation5 + $0x150] ss:$8 sps:$4 sm:$0xff]   ;;  %v1363_v18 = vld [vmem:[#allocation5 + $0x34] ss:$8 sps:$4 sm:$0xff]   ;;  %v1339_v19 = vld [vmem:[#allocation5 + $0x164] ss:$8 sps:$4 sm:$0xff]  }
  0x3e   :  { %819 = vmatprep.subr.bf16.mxu0 %v1327_v4  ;;  %v1365_v20 = vld [vmem:[#allocation5 + $0x30] ss:$8 sps:$4 sm:$0xff]   ;;  %v1341_v21 = vld [vmem:[#allocation5 + $0x160] ss:$8 sps:$4 sm:$0xff]   ;;  %v1369_v22 = vld [vmem:[#allocation5 + $0x44] ss:$8 sps:$4 sm:$0xff]  }
  0x3f   :  { %v1342_v23 = vld [vmem:[#allocation5 + $0x174] ss:$8 sps:$4 sm:$0xff]   ;;  %v1371_v24 = vld [vmem:[#allocation5 + $0x40] ss:$8 sps:$4 sm:$0xff]   ;;  %v1344_v25 = vld [vmem:[#allocation5 + $0x170] ss:$8 sps:$4 sm:$0xff]  }
  0x40   :  { %777 = vmatpush1.bf16.msra.mxu1 %v1353_v12  ;;  %v1375_v26 = vld [vmem:[#allocation5 + $0x54] ss:$8 sps:$4 sm:$0xff]   ;;  %v1348_v27 = vld [vmem:[#allocation5 + $0x184] ss:$8 sps:$4 sm:$0xff]   ;;  %v1377_v28 = vld [vmem:[#allocation5 + $0x50] ss:$8 sps:$4 sm:$0xff]  }
  0x41   :  { %820 = vmatpush1.bf16.msra.mxu0 %v1329_v5  ;;  %778 = vmatprep.subr.bf16.mxu1 %v1357_v15  ;;  %v1350_v29 = vld [vmem:[#allocation5 + $0x180] ss:$8 sps:$4 sm:$0xff]   ;;  %v1381_v30 = vld [vmem:[#allocation5 + $0x64] ss:$8 sps:$4 sm:$0xff]   ;;  %v1354_v31 = vld [vmem:[#allocation5 + $0x194] ss:$8 sps:$4 sm:$0xff]  }
  0x42   :  { %821 = vmatprep.subr.bf16.mxu0 %v1330_v6  ;;  %v1685_v32 = vld [vmem:[#allocation2 + $0x8] sm:$0xff]  ;;  %v1383_v34 = vld [vmem:[#allocation5 + $0x60] ss:$8 sps:$4 sm:$0xff]   ;;  %v1387_v36 = vld [vmem:[#allocation5 + $0x74] ss:$8 sps:$4 sm:$0xff]   ;;  %s1618_s8 = smov [#allocation8]  }
  0x43   :  { %v1356_v33 = vld [vmem:[#allocation5 + $0x190] ss:$8 sps:$4 sm:$0xff]   ;;  %v1147_v35 = vcombine.high %v1685_v32, %v1685_v32  ;;  %v1360_v37 = vld [vmem:[#allocation5 + $0x1a4] ss:$8 sps:$4 sm:$0xff]   ;;  %v1362_v38 = vld [vmem:[#allocation5 + $0x1a0] ss:$8 sps:$4 sm:$0xff]   ;;  %v1146_v1 = vcombine.low %v1685_v32, %v1685_v32 }
  0x44   :  { %779 = vmatpush1.bf16.msra.mxu1 %v1359_v16  ;;  %v1389_v39 = vld [vmem:[#allocation5 + $0x70] ss:$8 sps:$4 sm:$0xff]   ;;  %v1393_v40 = vld [vmem:[#allocation5 + $0x84] ss:$8 sps:$4 sm:$0xff]   ;;  %v1366_v41 = vld [vmem:[#allocation5 + $0x1b4] ss:$8 sps:$4 sm:$0xff]  }
  0x45   :  { %822 = vmatpush1.bf16.msra.mxu0 %v1332_v7  ;;  %780 = vmatprep.subr.bf16.mxu1 %v1363_v18  ;;  %v1368_v42 = vld [vmem:[#allocation5 + $0x1b0] ss:$8 sps:$4 sm:$0xff]   ;;  %v1395_v43 = vld [vmem:[#allocation5 + $0x80] ss:$8 sps:$4 sm:$0xff]   ;;  %v1401_v44 = vld [vmem:[#allocation5 + $0x94] ss:$8 sps:$4 sm:$0xff]  }
  0x46   :  { %823 = vmatprep.subr.bf16.mxu0 %v1333_v10  ;;  %847 = vmatprep.mubr.bf16.mxu0 %v1147_v35  ;;  %v1372_v45 = vld [vmem:[#allocation5 + $0x1c4] ss:$8 sps:$4 sm:$0xff]   ;;  %v1374_v46 = vld [vmem:[#allocation5 + $0x1c0] ss:$8 sps:$4 sm:$0xff]   ;;  %v1403_v47 = vld [vmem:[#allocation5 + $0x90] ss:$8 sps:$4 sm:$0xff]  }
  0x47   :  { %v1407_v48 = vld [vmem:[#allocation5 + $0xa4] ss:$8 sps:$4 sm:$0xff]   ;;  %v1378_v49 = vld [vmem:[#allocation5 + $0x1d4] ss:$8 sps:$4 sm:$0xff]   ;;  %v1380_v50 = vld [vmem:[#allocation5 + $0x1d0] ss:$8 sps:$4 sm:$0xff]  }
  0x48   :  { %781 = vmatpush1.bf16.msra.mxu1 %v1365_v20  ;;  %v1409_v51 = vld [vmem:[#allocation5 + $0xa0] ss:$8 sps:$4 sm:$0xff]   ;;  %v1413_v52 = vld [vmem:[#allocation5 + $0xb4] ss:$8 sps:$4 sm:$0xff]   ;;  %v1384_v53 = vld [vmem:[#allocation5 + $0x1e4] ss:$8 sps:$4 sm:$0xff]  }
  0x49   :  { %824 = vmatpush1.bf16.msra.mxu0 %v1335_v13  ;;  %782 = vmatprep.subr.bf16.mxu1 %v1369_v22  ;;  %v1386_v54 = vld [vmem:[#allocation5 + $0x1e0] ss:$8 sps:$4 sm:$0xff]   ;;  %v1415_v56 = vld [vmem:[#allocation5 + $0xb0] ss:$8 sps:$4 sm:$0xff]   ;;  %v1419_v58 = vld [vmem:[#allocation5 + $0xc4] ss:$8 sps:$4 sm:$0xff]  }
  0x4a   :  { %825 = vmatprep.subr.bf16.mxu0 %v1336_v14  ;;  %v61_v55 = vld [vmem:[#allocation2] sm:$0xff]  ;;  %v1390_v59 = vld [vmem:[#allocation5 + $0x1f4] ss:$8 sps:$4 sm:$0xff]   ;;  %v1392_v60 = vld [vmem:[#allocation5 + $0x1f0] ss:$8 sps:$4 sm:$0xff]   ;;  %s1134_s9 = sshll.u32 %s1618_s8, 4  ;;  %s1135_s9 = int_to_ptr.vmem [resolvable:$true] %s1134_s9 }
  0x4b   :  { %v1145_v57 = vcombine.high %v61_v55, %v61_v55  ;;  %v1421_v61 = vld [vmem:[#allocation5 + $0xc0] ss:$8 sps:$4 sm:$0xff]   ;;  %v1425_v62 = vld [vmem:[#allocation5 + $0xd4] ss:$8 sps:$4 sm:$0xff]   ;;  %v1400_v63 = vld [vmem:[#allocation5 + $0x204] ss:$8 sps:$4 sm:$0xff]   ;;  %v1144_v14 = vcombine.low %v61_v55, %v61_v55  ;;  %p1587_p11 = scmp.lt.s32.totalorder %s1135_s9, %s1135_s9 }
  0x4c   :  { %783 = vmatpush1.bf16.msra.mxu1 %v1371_v24  ;;  %v1398_v0 = vld [vmem:[#allocation5 + $0x200] ss:$8 sps:$4 sm:$0xff]   ;;  %v1427_v2 = vld [vmem:[#allocation5 + $0xd0] ss:$8 sps:$4 sm:$0xff]   ;;  %v1431_v3 = vld [vmem:[#allocation5 + $0xe4] ss:$8 sps:$4 sm:$0xff]  }
  0x4d   :  { %826 = vmatpush1.bf16.msra.mxu0 %v1338_v17  ;;  %784 = vmatprep.subr.bf16.mxu1 %v1375_v26  ;;  %v1406_v4 = vld [vmem:[#allocation5 + $0x214] ss:$8 sps:$4 sm:$0xff]   ;;  %v1404_v5 = vld [vmem:[#allocation5 + $0x210] ss:$8 sps:$4 sm:$0xff]   ;;  %v1433_v6 = vld [vmem:[#allocation5 + $0xe0] ss:$8 sps:$4 sm:$0xff]  }
  0x4e   :  { %827 = vmatprep.subr.bf16.mxu0 %v1339_v19  ;;  %806 = vmatprep.mubr.bf16.mxu1 %v1145_v57  ;;  %v1437_v7 = vld [vmem:[#allocation5 + $0xf4] ss:$8 sps:$4 sm:$0xff]   ;;  %v1412_v8 = vld [vmem:[#allocation5 + $0x224] ss:$8 sps:$4 sm:$0xff]   ;;  %v1410_v9 = vld [vmem:[#allocation5 + $0x220] ss:$8 sps:$4 sm:$0xff]  }
  0x4f   :  { %v1439_v10 = vld [vmem:[#allocation5 + $0xf0] ss:$8 sps:$4 sm:$0xff]   ;;  %v1447_v11 = vld [vmem:[#allocation5 + $0x304] ss:$8 sps:$4 sm:$0xff]   ;;  %v1418_v12 = vld [vmem:[#allocation5 + $0x234] ss:$8 sps:$4 sm:$0xff]  }
  0x50   :  { %785 = vmatpush1.bf16.msra.mxu1 %v1377_v28  ;;  %v1416_v13 = vld [vmem:[#allocation5 + $0x230] ss:$8 sps:$4 sm:$0xff]   ;;  %v1445_v15 = vld [vmem:[#allocation5 + $0x300] ss:$8 sps:$4 sm:$0xff]   ;;  %v1453_v16 = vld [vmem:[#allocation5 + $0x314] ss:$8 sps:$4 sm:$0xff]  }
  0x51   :  { %828 = vmatpush1.bf16.msra.mxu0 %v1341_v21  ;;  %786 = vmatprep.subr.bf16.mxu1 %v1381_v30  ;;  %v1691_v17 = vld [vmem:[#allocation2 + $0x10] sm:$0xff]  ;;  %v1424_v18 = vld [vmem:[#allocation5 + $0x244] ss:$8 sps:$4 sm:$0xff]   ;;  %v1422_v21 = vld [vmem:[#allocation5 + $0x240] ss:$8 sps:$4 sm:$0xff]   ;;  %v1617_v24 = vmov 0  }
  0x52   :  { %829 = vmatprep.subr.bf16.mxu0 %v1342_v23  ;;  %v1451_v19 = vld [vmem:[#allocation5 + $0x310] ss:$8 sps:$4 sm:$0xff]   ;;  %v1149_v20 = vcombine.high %v1691_v17, %v1691_v17  ;;  %v1459_v22 = vld [vmem:[#allocation5 + $0x324] ss:$8 sps:$4 sm:$0xff]   ;;  %v1430_v23 = vld [vmem:[#allocation5 + $0x254] ss:$8 sps:$4 sm:$0xff]  }
  0x53   :  { %v1428_v26 = vld [vmem:[#allocation5 + $0x250] ss:$8 sps:$4 sm:$0xff]   ;;  %v1436_v28 = vld [vmem:[#allocation5 + $0x264] ss:$8 sps:$4 sm:$0xff]   ;;  %v1434_v30 = vld [vmem:[#allocation5 + $0x260] ss:$8 sps:$4 sm:$0xff]  }
  0x54   :  { %787 = vmatpush1.bf16.msra.mxu1 %v1383_v34  ;;  %v1442_v32 = vld [vmem:[#allocation5 + $0x274] ss:$8 sps:$4 sm:$0xff]   ;;  %v1440_v34 = vld [vmem:[#allocation5 + $0x270] ss:$8 sps:$4 sm:$0xff]   ;;  %v1484_v55 = vld [vmem:[#allocation5 + $0x2e0] ss:$8 sps:$4 sm:$0xff]  }
  0x55   :  { %830 = vmatpush1.bf16.msra.mxu0 %v1344_v25  ;;  %788 = vmatprep.subr.bf16.mxu1 %v1387_v36  ;;  %v1457_v25 = vld [vmem:[#allocation5 + $0x320] ss:$8 sps:$4 sm:$0xff]   ;;  %v1477_v35 = vld [vmem:[#allocation5 + $0x354] ss:$8 sps:$4 sm:$0xff]   ;;  %v1450_v36 = vld [vmem:[#allocation5 + $0x284] ss:$8 sps:$4 sm:$0xff]  }
  0x56   :  { %831 = vmatprep.subr.bf16.mxu0 %v1348_v27  ;;  %v1465_v27 = vld [vmem:[#allocation5 + $0x334] ss:$8 sps:$4 sm:$0xff]   ;;  %v1490_v57 = vld [vmem:[#allocation5 + $0x2f0] ss:$8 sps:$4 sm:$0xff]  }
  0x58   :  { %789 = vmatpush1.bf16.msra.mxu1 %v1389_v39  ;;  %v1483_v39 = vld [vmem:[#allocation5 + $0x364] ss:$8 sps:$4 sm:$0xff]  }
  0x59   :  { %832 = vmatpush1.bf16.msra.mxu0 %v1350_v29  ;;  %790 = vmatprep.subr.bf16.mxu1 %v1393_v40  ;;  %v1463_v29 = vld [vmem:[#allocation5 + $0x330] ss:$8 sps:$4 sm:$0xff]   ;;  %v1456_v40 = vld [vmem:[#allocation5 + $0x294] ss:$8 sps:$4 sm:$0xff]  }
  0x5a   :  { %833 = vmatprep.subr.bf16.mxu0 %v1354_v31  ;;  %v1471_v31 = vld [vmem:[#allocation5 + $0x344] ss:$8 sps:$4 sm:$0xff]  }
  0x5c   :  { %791 = vmatpush1.bf16.msra.mxu1 %v1395_v43  ;;  %v1489_v43 = vld [vmem:[#allocation5 + $0x374] ss:$8 sps:$4 sm:$0xff]  }
  0x5d   :  { %834 = vmatpush1.bf16.msra.mxu0 %v1356_v33  ;;  %792 = vmatprep.subr.bf16.mxu1 %v1401_v44  ;;  %v1469_v33 = vld [vmem:[#allocation5 + $0x340] ss:$8 sps:$4 sm:$0xff]   ;;  %v1462_v44 = vld [vmem:[#allocation5 + $0x2a4] ss:$8 sps:$4 sm:$0xff]  }
  0x5e   :  { %835 = vmatprep.subr.bf16.mxu0 %v1360_v37  ;;  %v1475_v37 = vld [vmem:[#allocation5 + $0x350] ss:$8 sps:$4 sm:$0xff]  }
  0x60   :  { %793 = vmatpush1.bf16.msra.mxu1 %v1403_v47  ;;  %v1468_v47 = vld [vmem:[#allocation5 + $0x2b4] ss:$8 sps:$4 sm:$0xff]  }
  0x61   :  { %836 = vmatpush1.bf16.msra.mxu0 %v1362_v38  ;;  %794 = vmatprep.subr.bf16.mxu1 %v1407_v48  ;;  %v1448_v38 = vld [vmem:[#allocation5 + $0x280] ss:$8 sps:$4 sm:$0xff]   ;;  %v1495_v48 = vld [vmem:[#allocation2 + $0x18] ss:$0 sps:$4 sm:$0xff]  }
  0x62   :  { %837 = vmatprep.subr.bf16.mxu0 %v1366_v41  ;;  %v1481_v41 = vld [vmem:[#allocation5 + $0x360] ss:$8 sps:$4 sm:$0xff]  }
  0x64   :  { %795 = vmatpush1.bf16.msra.mxu1 %v1409_v51  ;;  %v1472_v51 = vld [vmem:[#allocation5 + $0x2c0] ss:$8 sps:$4 sm:$0xff]  }
  0x65   :  { %838 = vmatpush1.bf16.msra.mxu0 %v1368_v42  ;;  %796 = vmatprep.subr.bf16.mxu1 %v1413_v52  ;;  %v1454_v42 = vld [vmem:[#allocation5 + $0x290] ss:$8 sps:$4 sm:$0xff]   ;;  %v1480_v52 = vld [vmem:[#allocation5 + $0x2d4] ss:$8 sps:$4 sm:$0xff]  }
  0x66   :  { %839 = vmatprep.subr.bf16.mxu0 %v1372_v45  ;;  %v1487_v45 = vld [vmem:[#allocation5 + $0x370] ss:$8 sps:$4 sm:$0xff]  }
  0x68   :  { %797 = vmatpush1.bf16.msra.mxu1 %v1415_v56  ;;  %v1492_v56 = vld [vmem:[#allocation5 + $0x2f4] ss:$8 sps:$4 sm:$0xff]  }
  0x69   :  { %840 = vmatpush1.bf16.msra.mxu0 %v1374_v46  ;;  %798 = vmatprep.subr.bf16.mxu1 %v1419_v58  ;;  %v1460_v46 = vld [vmem:[#allocation5 + $0x2a0] ss:$8 sps:$4 sm:$0xff]   ;;  %v1148_v58 = vcombine.low %v1691_v17, %v1691_v17 }
  0x6a   :  { %841 = vmatprep.subr.bf16.mxu0 %v1378_v49  ;;  %v1466_v49 = vld [vmem:[#allocation5 + $0x2b0] ss:$8 sps:$4 sm:$0xff]  }
  0x6c   :  { %799 = vmatpush1.bf16.msra.mxu1 %v1421_v61  ;;  %v1498_v61 = vld [vmem:[#allocation7 + $0x48] sm:$0xff]  }
  0x6d   :  { %842 = vmatpush1.bf16.msra.mxu0 %v1380_v50  ;;  %800 = vmatprep.subr.bf16.mxu1 %v1425_v62  ;;  %v1474_v50 = vld [vmem:[#allocation5 + $0x2c4] ss:$8 sps:$4 sm:$0xff]  }
  0x6e   :  { %843 = vmatprep.subr.bf16.mxu0 %v1384_v53  ;;  %v1478_v53 = vld [vmem:[#allocation5 + $0x2d0] ss:$8 sps:$4 sm:$0xff]   ;;  %v1499_v62 = vld [vmem:[#allocation7 + $0x8] sm:$0xff]  }
  0x70   :  { %801 = vmatpush1.bf16.msra.mxu1 %v1427_v2  ;;  %v1503_v2 = vld [vmem:[#allocation7 + $0x18] sm:$0xff]  }
  0x71   :  { %844 = vmatpush1.bf16.msra.mxu0 %v1386_v54  ;;  %802 = vmatprep.subr.bf16.mxu1 %v1431_v3  ;;  %v1486_v54 = vld [vmem:[#allocation5 + $0x2e4] ss:$8 sps:$4 sm:$0xff]  }
  0x72   :  { %845 = vmatprep.subr.bf16.mxu0 %v1390_v59  ;;  %v1496_v59 = vld [vmem:[#allocation7 + $0x40] sm:$0xff]  }
  0x73   :  { %v1504_v3 = vld [vmem:[#allocation7 + $0x60] sm:$0xff]  }
  0x74   :  { %803 = vmatpush1.bf16.msra.mxu1 %v1433_v6  ;;  %v1507_v6 = vld [vmem:[#allocation7 + $0x28] sm:$0xff]  }
  0x75   :  { %846 = vmatpush1.bf16.msra.mxu0 %v1392_v60  ;;  %804 = vmatprep.subr.bf16.mxu1 %v1437_v7  ;;  %v1497_v60 = vld [vmem:[#allocation7] sm:$0xff]   ;;  %v1508_v7 = vld [vmem:[#allocation7 + $0x70] sm:$0xff]  }
  0x76   :  { %856 = vmatprep.subr.bf16.mxu0 %v1400_v63  ;;  %v1500_v63 = vld [vmem:[#allocation7 + $0x50] sm:$0xff]  }
  0x78   :  { %848 = vmatmul.mubr.bf16.vlgmr.msra.gmra.mrb[0].mxu0 %v1146_v1  ;;  %805 = vmatpush1.bf16.msra.mxu1 %v1439_v10  ;;  %v1502_v1 = vld [vmem:[#allocation7 + $0x58] sm:$0xff]  }
  0x79   :  { %857 = vmatpush1.bf16.msra.mxu0 %v1398_v0  ;;  %897 = vmatprep.subr.bf16.mxu1 %v1447_v11  ;;  %v1501_v0 = vld [vmem:[#allocation7 + $0x10] sm:$0xff]   ;;  %v1511_v10 = vld [vmem:[#allocation7 + $0x38] sm:$0xff]  }
  0x7a   :  { %858 = vmatprep.subr.bf16.mxu0 %v1406_v4  ;;  %888 = vmatprep.mubr.bf16.mxu0 %v1149_v20  ;;  %v1505_v4 = vld [vmem:[#allocation7 + $0x20] sm:$0xff]  }
  0x7b   :  { %807 = vmatmul.mubr.bf16.vlgmr.msra.gmra.mrb[0].mxu1 %v1144_v14 }
  0x7c   :  { %898 = vmatpush1.bf16.msra.mxu1 %v1445_v15  ;;  %929 = vmatprep.mubr.bf16.mxu1 %v1617_v24 }
  0x7d   :  { %859 = vmatpush1.bf16.msra.mxu0 %v1404_v5  ;;  %899 = vmatprep.subr.bf16.mxu1 %v1453_v16  ;;  %v1506_v5 = vld [vmem:[#allocation7 + $0x68] sm:$0xff]  }
  0x7e   :  { %860 = vmatprep.subr.bf16.mxu0 %v1412_v8  ;;  %v1509_v8 = vld [vmem:[#allocation7 + $0x30] sm:$0xff]  }
  0x80   :  { %900 = vmatpush1.bf16.msra.mxu1 %v1451_v19  ;;  %v179_v19 = vlaneseq }
  0x81   :  { %861 = vmatpush1.bf16.msra.mxu0 %v1410_v9  ;;  %901 = vmatprep.subr.bf16.mxu1 %v1459_v22  ;;  %v1510_v9 = vld [vmem:[#allocation7 + $0x78] sm:$0xff]   ;;  %v177_v22 = vld [vmem:[%s1717_s2] sm:$0x3] }
  0x82   :  { %862 = vmatprep.subr.bf16.mxu0 %v1418_v12  ;;  %v180_v20 = vshrl.u32 %v179_v19, 7 }
  0x84   :  { %902 = vmatpush1.bf16.msra.mxu1 %v1457_v25 }
  0x85   :  { %863 = vmatpush1.bf16.msra.mxu0 %v1416_v13  ;;  %903 = vmatprep.subr.bf16.mxu1 %v1465_v27 }
  0x86   :  { %864 = vmatprep.subr.bf16.mxu0 %v1424_v18 }
  0x88   :  { %904 = vmatpush1.bf16.msra.mxu1 %v1463_v29 }
  0x89   :  { %865 = vmatpush1.bf16.msra.mxu0 %v1422_v21  ;;  %905 = vmatprep.subr.bf16.mxu1 %v1471_v31  ;;  %v181_v21 = vsub.s32 0, %v180_v20 }
  0x8a   :  { %866 = vmatprep.subr.bf16.mxu0 %v1430_v23  ;;  %v185_v23 = vsub.s32 1, %v180_v20 }
  0x8b   :  { %v182_v24 = vrot.slane %v177_v22, %v181_v21 }
  0x8c   :  { %906 = vmatpush1.bf16.msra.mxu1 %v1469_v33  ;;  %v186_v25 = vrot.slane %v177_v22, %v185_v23 }
  0x8d   :  { %867 = vmatpush1.bf16.msra.mxu0 %v1428_v26  ;;  %907 = vmatprep.subr.bf16.mxu1 %v1477_v35 }
  0x8e   :  { %868 = vmatprep.subr.bf16.mxu0 %v1436_v28 }
  0x90   :  { %908 = vmatpush1.bf16.msra.mxu1 %v1475_v37 }
  0x91   :  { %869 = vmatpush1.bf16.msra.mxu0 %v1434_v30  ;;  %909 = vmatprep.subr.bf16.mxu1 %v1483_v39 }
  0x92   :  { %870 = vmatprep.subr.bf16.mxu0 %v1442_v32 }
  0x94   :  { %910 = vmatpush1.bf16.msra.mxu1 %v1481_v41 }
  0x95   :  { %871 = vmatpush1.bf16.msra.mxu0 %v1440_v34  ;;  %911 = vmatprep.subr.bf16.mxu1 %v1489_v43 }
  0x96   :  { %872 = vmatprep.subr.bf16.mxu0 %v1450_v36 }
  0x98   :  { %912 = vmatpush1.bf16.msra.mxu1 %v1487_v45 }
  0x99   :  { %873 = vmatpush1.bf16.msra.mxu0 %v1448_v38  ;;  %1280 = vmatprep.subr.bf16.mxu1 %v1496_v59 }
  0x9a   :  { %874 = vmatprep.subr.bf16.mxu0 %v1456_v40 }
  0x9b   :  { %930 = vmatmul.mubr.bf16.vlgmr.msra.gmra.mrb[4].mxu1 %v1495_v48 }
  0x9c   :  { %1281 = vmatpush3.bf16.msra.mxu1 %v1497_v60 }
  0x9d   :  { %875 = vmatpush1.bf16.msra.mxu0 %v1454_v42  ;;  %1282 = vmatprep.subr.bf16.mxu1 %v1498_v61  ;;  %v1263_v42 = vld [vmem:[%s1719_s4] ss:$0 sm:$0xff]  ;;  %s1582_s4 = scalar_lea.vmem %s1135_s9, 128 }
  0x9e   :  { %876 = vmatprep.subr.bf16.mxu0 %v1462_v44  ;;  %p1583_p10 = scmp.ne.s32.totalorder %s1135_s9, %s1582_s4  ;;  %p1588_p12 = scmp.lt.s32.totalorder %s1582_s4, %s1582_s4 }
  0xa0   :  { %1283 = vmatpush3.bf16.msra.mxu1 %v1499_v62  ;;  %p1589_p13 = por %p1588_p12, %p1587_p11 }
  0xa1   :  { %877 = vmatpush1.bf16.msra.mxu0 %v1460_v46  ;;  %1284 = vmatprep.subr.bf16.mxu1 %v1500_v63 }
  0xa2   :  { %878 = vmatprep.subr.bf16.mxu0 %v1468_v47  ;;  %p1590_p0 = pnand %p1589_p13, %p1583_p10 }
  0xa4   :  { %1285 = vmatpush3.bf16.msra.mxu1 %v1501_v0 }
  0xa5   :  { %879 = vmatpush1.bf16.msra.mxu0 %v1466_v49  ;;  %1286 = vmatprep.subr.bf16.mxu1 %v1502_v1 }
  0xa6   :  { %880 = vmatprep.subr.bf16.mxu0 %v1474_v50 }
  0xa8   :  { %1287 = vmatpush3.bf16.msra.mxu1 %v1503_v2 }
  0xa9   :  { %881 = vmatpush1.bf16.msra.mxu0 %v1472_v51  ;;  %1288 = vmatprep.subr.bf16.mxu1 %v1504_v3 }
  0xaa   :  { %882 = vmatprep.subr.bf16.mxu0 %v1480_v52 }
  0xac   :  { %1289 = vmatpush3.bf16.msra.mxu1 %v1505_v4 }
  0xad   :  { %883 = vmatpush1.bf16.msra.mxu0 %v1478_v53  ;;  %1290 = vmatprep.subr.bf16.mxu1 %v1506_v5 }
  0xae   :  { %884 = vmatprep.subr.bf16.mxu0 %v1486_v54 }
  0xb0   :  { %1291 = vmatpush3.bf16.msra.mxu1 %v1507_v6 }
  0xb1   :  { %885 = vmatpush1.bf16.msra.mxu0 %v1484_v55  ;;  %1292 = vmatprep.subr.bf16.mxu1 %v1508_v7 }
  0xb2   :  { %886 = vmatprep.subr.bf16.mxu0 %v1492_v56 }
  0xb4   :  { %1293 = vmatpush3.bf16.msra.mxu1 %v1509_v8 }
  0xb5   :  { %887 = vmatpush1.bf16.msra.mxu0 %v1490_v57  ;;  %1294 = vmatprep.subr.bf16.mxu1 %v1510_v9 }
  0xb8   :  { %889 = vmatmul.mubr.bf16.vlgmr.msra.gmra.mrb[0].mxu0 %v1148_v58  ;;  %1295 = vmatpush3.bf16.msra.mxu1 %v1511_v10 }
 0x14e   :  { %v808_v11 = vpop.f32.mrb[0].mxu1 }
 0x14f   :  { %v810_v12 = vpop.f32.mrb[1].mxu1  ;;  %v809_v26 = vadd.f32 %v808_v11, %v182_v24 }
 0x150   :  { %v812_v13 = vpop.f32.mrb[2].mxu1  ;;  %v811_v27 = vadd.f32 %v810_v12, %v186_v25 }
 0x151   :  { %v813_v14 = vpop.f32.mrb[3].mxu1 }
 0x16e   :  { %v931_v15 = vpop.f32.mrb[4].mxu1 }
 0x16f   :  { %v933_v16 = vpop.f32.mrb[5].mxu1 }
 0x170   :  { %v935_v17 = vpop.f32.mrb[6].mxu1 }
 0x171   :  { %v936_v18 = vpop.f32.mrb[7].mxu1 }
 0x18b   :  { %v890_v28 = vpop.f32.mrb[0].mxu0 }
 0x18c   :  { %v1303_v29 = vadd.f32 %v890_v28, %v809_v26  ;;  %v892_v30 = vpop.f32.mrb[1].mxu0 }
 0x18d   :  { %v1306_v31 = vadd.f32 %v892_v30, %v811_v27  ;;  %v894_v32 = vpop.f32.mrb[2].mxu0 }
 0x18e   :  { %v1304_v33 = vadd.f32 %v1303_v29, %v931_v15  ;;  %v895_v34 = vpop.f32.mrb[3].mxu0 }
 0x18f   :  { %v1307_v35 = vadd.f32 %v1306_v31, %v933_v16 }
 0x190   :  { %v938_v36 = vmax.f32 %v1304_v33, 0.0 }
 0x191   :  { %v939_v37 = vmax.f32 %v1307_v35, 0.0 }
 0x192   :  { %v940_v39 = vpack.c.bf16 %v938_v36, %v938_v36 }
 0x193   :  { %v941_v38 = vpack.c.bf16 %v939_v37, %v939_v37 }
 0x195   :  { %1109 = vmatprep.mubr.bf16.mxu1 %v941_v38 }
 0x196   :  { %1110 = vmatmul.mubr.bf16.vlgmr.msra.gmra.mrb[8].mxu1 %v940_v39 }
 0x269   :  { %v1296_v40 = vpop.f32.mrb[8].mxu1 }
 0x26a   :  { %v1297_v41 = vpop.f32.mrb[9].mxu1 }
 0x26b   :  { %v1298_v43 = vadd.f32 %v1297_v41, %v1296_v40  ;;  %v1299_v44 = vpop.f32.mrb[10].mxu1 }
 0x26c   :  { %v1300_v45 = vpop.f32.mrb[11].mxu1 }
 0x26d   :  { %v1112_v46 = vadd.f32 %v1298_v43, %v1263_v42 }
 0x26f   :  { %1117 = vmax.xlane.f32.xlu0 %v1112_v46 }
 0x2fc   :  { %v1118_v47 = vpop.xlane.xlu0 %1117 }
 0x2fd   :  { %v1119_v48 = vsub.f32 %v1112_v46, %v1118_v47 }
 0x2ff   :  { %v1120_v49 = vmul.f32 1.442695, %v1119_v48 }
 0x301   :  { %1512 = vpow2.f32 %v1120_v49 }
 0x30b   :  { %v1513_v50 = vpop.eup %1512 }
 0x30c   :  { %1122 = vadd.xlane.f32.xlu0 %v1513_v50 }
 0x399   :  { %v1123_v51 = vpop.xlane.xlu0 %1122 }
 0x39a   :  { %1514 = vrcp.f32 %v1123_v51 }
 0x3a4   :  { %v1515_v52 = vpop.eup %1514 }
 0x3a5   :  { %v1126_v53 = vmul.f32 %v1515_v52, %v1513_v50 }
 0x3a7   :  { %1127 = vst [vmem:[#allocation8] sm:$0xff] %v1126_v53 }
 0x3a8   :  { %1593 = shalt.err (!%p1590_p0)
}
 0x3a9   :  { %s1594_s12 = scalar_lea.hbm %s1720_s5, 128 }
 0x3aa   :  { %p1595_p1 = scmp.ne.s32.totalorder %s1720_s5, %s1594_s12  ;;  %p1598_p2 = scmp.lt.u32.totalorder %s1594_s12, %s1720_s5 }
 0x3ac   :  { %p1600_p3 = pnand %p1598_p2, %p1595_p1 }
 0x3ae   :  { %1603 = shalt.err (!%p1600_p3)
}
 0x3af   :  { %1137 = dma.vmem_to_hbm [thread:$0]  %s1135_s9, 128, %s1720_s5, [#allocation4]  }
 0x3b0   :  { %1608 = dma.done.wait [#allocation4], 128  }
 0x3b1   :  { %1609 = vsyncadd [#allocation4], 4294967168 }
 0x3b2   :  { %1141 = vsyncpa [#allocation3], 1 }
 0x3b3   :  { %1142 = vsyncpa [#allocation6], 1 }
 0x3b4   :  { %1143 = vsyncpa [#allocation4], 1 }

</bundles_post_ra>
